<compile_context>
chip_gen: v7x
topology: tpu7x:2x2x1
jax: 0.10.0
libtpu: 0.0.40
codegen_flags: <defaults>
</compile_context>

<pallas_src>
import jax
import jax.numpy as jnp
from jax import lax
from jax.experimental import pallas as pl
from jax.experimental.pallas import tpu as pltpu


def _round_up(x, m):
    return (x + m - 1) // m * m


# ---------------------------------------------------------------------------
# Kernel: lane-dense tiled matmul (the conv hot path).
# ---------------------------------------------------------------------------
def _conv_matmul_kernel(p_ref, w_ref, y_ref):
    y_ref[...] = jnp.dot(
        p_ref[...], w_ref[...], preferred_element_type=jnp.float32
    ).astype(y_ref.dtype)


def _im2col_dilated(x, kH, kW, stride, d, pad):
    """x: [N, Cin, H, W] -> patches [N*Hout*Wout, Cin*kH*kW]; K idx = c*kH*kW + kh*kW + kw."""
    N, C, H, W = x.shape
    xp = jnp.pad(x, ((0, 0), (0, 0), (pad, pad), (pad, pad)))
    Hp, Wp = H + 2 * pad, W + 2 * pad
    Hout = (Hp - ((kH - 1) * d + 1)) // stride + 1
    Wout = (Wp - ((kW - 1) * d + 1)) // stride + 1
    taps = []
    for kh in range(kH):
        for kw in range(kW):
            taps.append(
                xp[:, :,
                   kh * d: kh * d + stride * (Hout - 1) + 1: stride,
                   kw * d: kw * d + stride * (Wout - 1) + 1: stride]
            )  # each [N, C, Hout, Wout]
    cols = jnp.stack(taps, axis=2)                           # [N, C, kH*kW, Hout, Wout]
    patches = cols.reshape(N, C * kH * kW, Hout, Wout)
    patches = patches.transpose(0, 2, 3, 1).reshape(N * Hout * Wout, C * kH * kW)
    return patches, Hout, Wout


def _weight_to_matmul(conv_w, groups, Cout_pad):
    """[Cout, Cin//groups, kH, kW] -> block-diagonal [Cin*kH*kW, Cout_pad]."""
    Cout, cpg_in, kH, kW = conv_w.shape
    cpg_out = Cout // groups
    Kg = cpg_in * kH * kW
    K = groups * Kg
    wg = conv_w.reshape(groups, cpg_out, cpg_in, kH, kW)
    blocks = wg.transpose(0, 2, 3, 4, 1).reshape(groups, Kg, cpg_out)
    w2d = jnp.zeros((K, Cout_pad), dtype=conv_w.dtype)
    for g in range(groups):
        w2d = w2d.at[g * Kg:(g + 1) * Kg, g * cpg_out:(g + 1) * cpg_out].set(blocks[g])
    return w2d


def _choose_tm(M, K, tn, in_bytes=2, out_bytes=4, budget_bytes=24 * 1024 * 1024):
    """Largest row tile whose double-buffered working set fits a v7x-safe VMEM budget."""
    tm = 16
    for cand in (2048, 1024, 512, 256, 128, 64, 32, 16):
        need = 2 * cand * K * in_bytes + 2 * cand * tn * out_bytes + 2 * K * tn * in_bytes
        if need <= budget_bytes:
            tm = cand
            break
    # no point tiling beyond (padded) M itself
    return max(16, min(tm, _round_up(M, 16)))


def cdilated_forward(x, conv_w, *, stride=1, d=1, groups=1):
    """CDilated forward: dilated conv2d, bias=False, padding = (kSize-1)//2 * d.

    x:      [N, Cin, H, W]            (NCHW, PyTorch layout)
    conv_w: [Cout, Cin//groups, kH, kW]
    """
    N, Cin, H, W = x.shape
    Cout, cpg_in, kH, kW = conv_w.shape
    assert Cin == cpg_in * groups and Cout % groups == 0
    pad = (kH - 1) // 2 * d

    patches, Hout, Wout = _im2col_dilated(x, kH, kW, stride, d, pad)
    M = N * Hout * Wout
    K = Cin * kH * kW

    Cout_pad = _round_up(Cout, 128)                  # lane-dense output columns
    tn = 256 if Cout_pad % 256 == 0 else 128
    tm = _choose_tm(M, K, tn)
    Mpad = _round_up(M, tm)

    patches = jnp.pad(patches, ((0, Mpad - M), (0, 0))).astype(jnp.bfloat16)
    w2d = _weight_to_matmul(conv_w, groups, Cout_pad).astype(jnp.bfloat16)
    out_dtype = x.dtype

    y = pl.pallas_call(
        _conv_matmul_kernel,
        out_shape=jax.ShapeDtypeStruct((Mpad, Cout_pad), out_dtype),
        grid_spec=pltpu.PrefetchScalarGridSpec(
            num_scalar_prefetch=0,
            grid=(Mpad // tm, Cout_pad // tn),
            in_specs=[
                pl.BlockSpec((tm, K), lambda i, j: (i, 0)),
                pl.BlockSpec((K, tn), lambda i, j: (0, j)),
            ],
            out_specs=pl.BlockSpec((tm, tn), lambda i, j: (i, j)),
        ),
        compiler_params=pltpu.CompilerParams(
            dimension_semantics=("parallel", "parallel"),
            vmem_limit_bytes=32 * 1024 * 1024,
        ),
    )(patches, w2d)

    # internal [Mpad, Cout_pad] -> NCHW
    out = y[:M, :Cout].reshape(N, Hout, Wout, Cout).transpose(0, 3, 1, 2)
    return out


def _reference_cdilated(x, conv_w, *, stride, d, groups, compute_dtype=jnp.bfloat16):
    """Pure-JAX reference matching PyTorch CDilated.forward."""
    kH = conv_w.shape[2]
    pad = (kH - 1) // 2 * d
    y = lax.conv_general_dilated(
        x.astype(compute_dtype), conv_w.astype(compute_dtype),
        window_strides=(stride, stride),
        padding=((pad, pad), (pad, pad)),
        rhs_dilation=(d, d),
        dimension_numbers=("NCHW", "OIHW", "NCHW"),
        feature_group_count=groups,
        preferred_element_type=jnp.float32,
    )
    return y.astype(x.dtype)


if __name__ == "__main__":
    key = jax.random.PRNGKey(0)
    kx, kw1, kw2 = jax.random.split(key, 3)

    # CDilated(nIn=4, nOut=8, kSize=3, stride=1, d=2, groups=1)
    N, Cin, H, W = 2, 4, 16, 16
    Cout, kSize, d = 8, 3, 2
    x = jax.random.normal(kx, (N, Cin, H, W), dtype=jnp.float32)
    w = 0.1 * jax.random.normal(kw1, (Cout, Cin, kSize, kSize), dtype=jnp.float32)

    out = cdilated_forward(x, w, stride=1, d=d, groups=1)
    out = jax.block_until_ready(out)
    assert out.shape == (N, Cout, H, W)

    ref_bf16 = _reference_cdilated(x, w, stride=1, d=d, groups=1)
    assert jnp.allclose(out, ref_bf16, rtol=1e-2, atol=1e-2), "mismatch vs bf16 conv reference"
    ref_f32 = _reference_cdilated(x, w, stride=1, d=d, groups=1, compute_dtype=jnp.float32)
    assert jnp.allclose(out, ref_f32, rtol=5e-2, atol=5e-2), "mismatch vs f32 conv reference"

    # Also exercise stride=2 and grouped conv (CDilated supports both).
    groups2, stride2 = 2, 2
    w2 = 0.1 * jax.random.normal(kw2, (Cout, Cin // groups2, kSize, kSize), dtype=jnp.float32)
    out2 = jax.block_until_ready(cdilated_forward(x, w2, stride=stride2, d=1, groups=groups2))
    ref2 = _reference_cdilated(x, w2, stride=stride2, d=1, groups=groups2)
    assert out2.shape == ref2.shape
    assert jnp.allclose(out2, ref2, rtol=1e-2, atol=1e-2), "mismatch (stride=2, groups=2)"

    print("KERNEL_OK")
</pallas_src>

<mosaic_0001>
module attributes {stable_mosaic.version = 11 : i64} {
  func.func @_conv_matmul_kernel(%arg0: i32, %arg1: i32, %arg2: memref<512x36xbf16, #tpu.memory_space<vmem>>, %arg3: memref<36x128xbf16, #tpu.memory_space<vmem>>, %arg4: memref<512x128xf32, #tpu.memory_space<vmem>>) attributes {dimension_semantics = [#tpu.dimension_semantics<parallel>, #tpu.dimension_semantics<parallel>], iteration_bounds = array<i64: 1, 1>, scalar_prefetch = 0 : i64, scratch_operands = 0 : i64, tpu.core_type = #tpu.core_type<tc>, window_params = [{transform_indices = @transform_0, window_bounds = array<i64: 512, 36>}, {transform_indices = @transform_1, window_bounds = array<i64: 36, 128>}, {transform_indices = @transform_2, window_bounds = array<i64: 512, 128>}]} {
    %c0 = arith.constant 0 : index
    %c0_0 = arith.constant 0 : index
    %0 = vector.load %arg2[%c0, %c0_0] : memref<512x36xbf16, #tpu.memory_space<vmem>>, vector<512x36xbf16>
    %c0_1 = arith.constant 0 : index
    %c0_2 = arith.constant 0 : index
    %1 = vector.load %arg3[%c0_1, %c0_2] : memref<36x128xbf16, #tpu.memory_space<vmem>>, vector<36x128xbf16>
    %cst = arith.constant dense<0.000000e+00> : vector<512x128xf32>
    %2 = tpu.matmul %0, %1, %cst {dimension_numbers = #tpu.dot_dimension_numbers<[1], [0], [0], [1], [0, 0, 1, 1], [], []>} : vector<512x36xbf16>, vector<36x128xbf16>, vector<512x128xf32> -> vector<512x128xf32>
    %c0_3 = arith.constant 0 : index
    %c0_4 = arith.constant 0 : index
    %3 = vector.load %arg4[%c0_3, %c0_4] : memref<512x128xf32, #tpu.memory_space<vmem>>, vector<512x128xf32>
    tpu.vector_store %arg4[%c0_3, %c0_4], %2 {strides = array<i32>} : memref<512x128xf32, #tpu.memory_space<vmem>>, vector<512x128xf32>,
    return
  }
  func.func @transform_0(%arg0: i32, %arg1: i32) -> (i32, i32) {
    %c0_i32 = arith.constant 0 : i32
    %c0_i32_0 = arith.constant 0 : i32
    return %arg0, %c0_i32 : i32, i32
  }
  func.func @transform_1(%arg0: i32, %arg1: i32) -> (i32, i32) {
    %c0_i32 = arith.constant 0 : i32
    %c0_i32_0 = arith.constant 0 : i32
    return %c0_i32, %arg1 : i32, i32
  }
  func.func @transform_2(%arg0: i32, %arg1: i32) -> (i32, i32) {
    %c0_i32 = arith.constant 0 : i32
    return %arg0, %arg1 : i32, i32
  }
}

</mosaic_0001>

<bundles_post_ra>
// kernel: tpu_custom_call.1
= control target key start
LH: loop header
LB: loop body
LE: loop exit
PB: predicated region body
PF: predicated region fallthrough
CT: control target
= control target key end

     0   :  { %vm257_vm0 = vcmask 293888   ;;  %vm354_vm1 = vcmask 1041408   ;;  %s1136_s0 = inlined_call_operand.vmem [shape: bf16[512,36], index: 0, kind: input, shape index: {}]   ;;  %s1137_s1 = inlined_call_operand.vmem [shape: bf16[36,128], index: 1, kind: input, shape index: {}]   ;;  %s1138_s2 = inlined_call_operand.hbm [shape: f32[512,128], index: 2, kind: output, shape index: {}]  }
   0x1   :  { %v910_v0 = vld [vmem:[%s1137_s1] sm:$0xff]   ;;  %v911_v1 = vld [vmem:[%s1137_s1 + $0x8] sm:$0xff]   ;;  %v912_v2 = vld [vmem:[%s1137_s1 + $0x10] ss:$0 sps:$4 sm:$0x33]  }
   0x2   :  { %829 = vmatprep.subr.bf16.mxu0 %v910_v0  ;;  %899 = vmatprep.subr.bf16.mxu1 %v910_v0  ;;  %v913_v3 = vld [vmem:[%s1136_s0] sm:$0xff]   ;;  %v356_v5 = vsel %vm354_vm1, %v912_v2, 0  ;;  %v915_v6 = vld [vmem:[%s1136_s0 + $0x8] sm:$0xff]   ;;  %v917_v8 = vld [vmem:[%s1136_s0 + $0x10] sm:$0xff]  }
   0x3   :  { %830 = vmatpush3.bf16.msra.mxu0 %v910_v0  ;;  %902 = vmatpush3.bf16.msra.mxu1 %v910_v0  ;;  %v914_v4 = vld [vmem:[%s1136_s0 + $0x80] sm:$0xff]   ;;  %v916_v7 = vld [vmem:[%s1136_s0 + $0x88] sm:$0xff]   ;;  %v918_v9 = vld [vmem:[%s1136_s0 + $0x90] sm:$0xff]  }
   0x4   :  { %831 = vmatprep.subr.bf16.mxu0 %v911_v1  ;;  %900 = vmatprep.subr.bf16.mxu1 %v911_v1  ;;  %v919_v10 = vld [vmem:[%s1136_s0 + $0x18] sm:$0xff]   ;;  %v921_v12 = vld [vmem:[%s1136_s0 + $0x20] sm:$0xff]   ;;  %v923_v14 = vld [vmem:[%s1136_s0 + $0x28] sm:$0xff]  }
   0x5   :  { %835 = vmatprep.mubr.msk.bf16.mxu0 %vm257_vm0, %v913_v3  ;;  %867 = vmatprep.mubr.msk.bf16.mxu1 %vm257_vm0, %v914_v4  ;;  %v920_v11 = vld [vmem:[%s1136_s0 + $0x98] sm:$0xff]   ;;  %v922_v13 = vld [vmem:[%s1136_s0 + $0xa0] sm:$0xff]   ;;  %v924_v15 = vld [vmem:[%s1136_s0 + $0xa8] sm:$0xff]  }
   0x6   :  { %v925_v16 = vld [vmem:[%s1136_s0 + $0x30] sm:$0xff]   ;;  %v927_v18 = vld [vmem:[%s1136_s0 + $0x38] sm:$0xff]  }
   0x7   :  { %832 = vmatpush3.bf16.msra.mxu0 %v911_v1  ;;  %903 = vmatpush3.bf16.msra.mxu1 %v911_v1  ;;  %v926_v17 = vld [vmem:[%s1136_s0 + $0xb0] sm:$0xff]   ;;  %v928_v19 = vld [vmem:[%s1136_s0 + $0xb8] sm:$0xff]  }
   0x8   :  { %905 = vmatprep.subr.msk.bf16.mxu0 %vm354_vm1, %v912_v2  ;;  %906 = vmatprep.subr.msk.bf16.mxu1 %vm354_vm1, %v912_v2 }
   0xb   :  { %834 = vmatpush3.bf16.msra.mxu0 %v356_v5  ;;  %904 = vmatpush3.bf16.msra.mxu1 %v356_v5 }
   0xe   :  { %836 = vmatmul.mubr.msk.bf16.vlgmr.msra.gmra.mrb[0].mxu0 %vm257_vm0, %v915_v6  ;;  %868 = vmatmul.mubr.msk.bf16.vlgmr.msra.gmra.mrb[0].mxu1 %vm257_vm0, %v916_v7 }
   0xf   :  { %839 = vmatprep.mubr.msk.bf16.mxu0 %vm257_vm0, %v917_v8  ;;  %871 = vmatprep.mubr.msk.bf16.mxu1 %vm257_vm0, %v918_v9 }
  0x16   :  { %840 = vmatmul.mubr.msk.bf16.gmra.mrb[4].mxu0 %vm257_vm0, %v919_v10  ;;  %872 = vmatmul.mubr.msk.bf16.gmra.mrb[4].mxu1 %vm257_vm0, %v920_v11 }
  0x17   :  { %843 = vmatprep.mubr.msk.bf16.mxu0 %vm257_vm0, %v921_v12  ;;  %875 = vmatprep.mubr.msk.bf16.mxu1 %vm257_vm0, %v922_v13 }
  0x1e   :  { %844 = vmatmul.mubr.msk.bf16.gmra.mrb[8].mxu0 %vm257_vm0, %v923_v14  ;;  %876 = vmatmul.mubr.msk.bf16.gmra.mrb[8].mxu1 %vm257_vm0, %v924_v15 }
  0x1f   :  { %847 = vmatprep.mubr.msk.bf16.mxu0 %vm257_vm0, %v925_v16  ;;  %879 = vmatprep.mubr.msk.bf16.mxu1 %vm257_vm0, %v926_v17 }
  0x20   :  { %7 = vsyncpa [#allocation3], 0  ;;  %v929_v20 = vld [vmem:[%s1136_s0 + $0x40] sm:$0xff]   ;;  %v931_v22 = vld [vmem:[%s1136_s0 + $0x48] sm:$0xff]  }
  0x21   :  { %v930_v21 = vld [vmem:[%s1136_s0 + $0xc0] sm:$0xff]   ;;  %v932_v23 = vld [vmem:[%s1136_s0 + $0xc8] sm:$0xff]   ;;  %v933_v24 = vld [vmem:[%s1136_s0 + $0x50] sm:$0xff]  }
  0x22   :  { %v934_v25 = vld [vmem:[%s1136_s0 + $0xd0] sm:$0xff]   ;;  %v935_v26 = vld [vmem:[%s1136_s0 + $0x58] sm:$0xff]   ;;  %v937_v28 = vld [vmem:[%s1136_s0 + $0x60] sm:$0xff]  }
  0x23   :  { %v936_v27 = vld [vmem:[%s1136_s0 + $0xd8] sm:$0xff]   ;;  %v938_v29 = vld [vmem:[%s1136_s0 + $0xe0] sm:$0xff]   ;;  %v939_v30 = vld [vmem:[%s1136_s0 + $0x68] sm:$0xff]  }
  0x24   :  { %v940_v31 = vld [vmem:[%s1136_s0 + $0xe8] sm:$0xff]   ;;  %v941_v32 = vld [vmem:[%s1136_s0 + $0x70] sm:$0xff]   ;;  %v943_v34 = vld [vmem:[%s1136_s0 + $0x78] sm:$0xff]  }
  0x25   :  { %v942_v33 = vld [vmem:[%s1136_s0 + $0xf0] sm:$0xff]   ;;  %v944_v35 = vld [vmem:[%s1136_s0 + $0xf8] sm:$0xff]   ;;  %s969_s0 = smov [#allocation2]  }
  0x26   :  { %848 = vmatmul.mubr.msk.bf16.gmra.mrb[12].mxu0 %vm257_vm0, %v927_v18  ;;  %880 = vmatmul.mubr.msk.bf16.gmra.mrb[12].mxu1 %vm257_vm0, %v928_v19  ;;  %s716_s20 = sshll.u32 %s969_s0, 4  ;;  %s717_s20 = int_to_ptr.vmem [resolvable:$true] %s716_s20 }
  0x27   :  { %851 = vmatprep.mubr.msk.bf16.mxu0 %vm257_vm0, %v929_v20  ;;  %883 = vmatprep.mubr.msk.bf16.mxu1 %vm257_vm0, %v930_v21  ;;  %s945_s21 = scalar_lea.vmem %s717_s20, 8192  ;;  %p950_p1 = scmp.lt.s32.totalorder %s717_s20, %s717_s20 }
  0x28   :  { %p946_p0 = scmp.ne.s32.totalorder %s717_s20, %s945_s21  ;;  %p951_p2 = scmp.lt.s32.totalorder %s945_s21, %s945_s21 }
  0x2a   :  { %p952_p3 = por %p951_p2, %p950_p1 }
  0x2c   :  { %p953_p4 = pnand %p952_p3, %p946_p0 }
  0x2e   :  { %852 = vmatmul.mubr.msk.bf16.gmra.mrb[16].mxu0 %vm257_vm0, %v931_v22  ;;  %884 = vmatmul.mubr.msk.bf16.gmra.mrb[16].mxu1 %vm257_vm0, %v932_v23 }
  0x2f   :  { %855 = vmatprep.mubr.msk.bf16.mxu0 %vm257_vm0, %v933_v24  ;;  %887 = vmatprep.mubr.msk.bf16.mxu1 %vm257_vm0, %v934_v25 }
  0x36   :  { %856 = vmatmul.mubr.msk.bf16.gmra.mrb[20].mxu0 %vm257_vm0, %v935_v26  ;;  %888 = vmatmul.mubr.msk.bf16.gmra.mrb[20].mxu1 %vm257_vm0, %v936_v27 }
  0x37   :  { %859 = vmatprep.mubr.msk.bf16.mxu0 %vm257_vm0, %v937_v28  ;;  %891 = vmatprep.mubr.msk.bf16.mxu1 %vm257_vm0, %v938_v29 }
  0x3e   :  { %860 = vmatmul.mubr.msk.bf16.gmra.mrb[24].mxu0 %vm257_vm0, %v939_v30  ;;  %892 = vmatmul.mubr.msk.bf16.gmra.mrb[24].mxu1 %vm257_vm0, %v940_v31 }
  0x3f   :  { %863 = vmatprep.mubr.msk.bf16.mxu0 %vm257_vm0, %v941_v32  ;;  %895 = vmatprep.mubr.msk.bf16.mxu1 %vm257_vm0, %v942_v33 }
  0x46   :  { %864 = vmatmul.mubr.msk.bf16.gmra.mrb[28].mxu0 %vm257_vm0, %v943_v34  ;;  %896 = vmatmul.mubr.msk.bf16.gmra.mrb[28].mxu1 %vm257_vm0, %v944_v35 }
  0xe1   :  { %v837_v36 = vpop.f32.mrb[0].mxu0  ;;  %v869_v37 = vpop.f32.mrb[0].mxu1 }
  0xe2   :  { %649 = vst [vmem:[#allocation2 + $0x10] sm:$0xff] %v837_v36  ;;  %681 = vst [vmem:[#allocation2 + $0x110] sm:$0xff] %v869_v37  ;;  %v392_v38 = vpop.f32.mrb[1].mxu0  ;;  %v520_v39 = vpop.f32.mrb[1].mxu1 }
  0xe3   :  { %647 = vst [vmem:[#allocation2] sm:$0xff] %v392_v38  ;;  %679 = vst [vmem:[#allocation2 + $0x100] sm:$0xff] %v520_v39  ;;  %v838_v40 = vpop.f32.mrb[2].mxu0  ;;  %v870_v41 = vpop.f32.mrb[2].mxu1 }
  0xe4   :  { %650 = vst [vmem:[#allocation2 + $0x18] sm:$0xff] %v838_v40  ;;  %682 = vst [vmem:[#allocation2 + $0x118] sm:$0xff] %v870_v41  ;;  %v395_v42 = vpop.f32.mrb[3].mxu0  ;;  %v523_v43 = vpop.f32.mrb[3].mxu1 }
  0xe5   :  { %648 = vst [vmem:[#allocation2 + $0x8] sm:$0xff] %v395_v42  ;;  %680 = vst [vmem:[#allocation2 + $0x108] sm:$0xff] %v523_v43 }
  0xe9   :  { %v841_v44 = vpop.f32.mrb[4].mxu0  ;;  %v873_v45 = vpop.f32.mrb[4].mxu1 }
  0xea   :  { %653 = vst [vmem:[#allocation2 + $0x30] sm:$0xff] %v841_v44  ;;  %685 = vst [vmem:[#allocation2 + $0x130] sm:$0xff] %v873_v45  ;;  %v408_v46 = vpop.f32.mrb[5].mxu0  ;;  %v536_v47 = vpop.f32.mrb[5].mxu1 }
  0xeb   :  { %651 = vst [vmem:[#allocation2 + $0x20] sm:$0xff] %v408_v46  ;;  %683 = vst [vmem:[#allocation2 + $0x120] sm:$0xff] %v536_v47  ;;  %v842_v48 = vpop.f32.mrb[6].mxu0  ;;  %v874_v49 = vpop.f32.mrb[6].mxu1 }
  0xec   :  { %654 = vst [vmem:[#allocation2 + $0x38] sm:$0xff] %v842_v48  ;;  %686 = vst [vmem:[#allocation2 + $0x138] sm:$0xff] %v874_v49  ;;  %v411_v50 = vpop.f32.mrb[7].mxu0  ;;  %v539_v51 = vpop.f32.mrb[7].mxu1 }
  0xed   :  { %652 = vst [vmem:[#allocation2 + $0x28] sm:$0xff] %v411_v50  ;;  %684 = vst [vmem:[#allocation2 + $0x128] sm:$0xff] %v539_v51 }
  0xf1   :  { %v845_v52 = vpop.f32.mrb[8].mxu0  ;;  %v877_v53 = vpop.f32.mrb[8].mxu1 }
  0xf2   :  { %657 = vst [vmem:[#allocation2 + $0x50] sm:$0xff] %v845_v52  ;;  %689 = vst [vmem:[#allocation2 + $0x150] sm:$0xff] %v877_v53  ;;  %v424_v54 = vpop.f32.mrb[9].mxu0  ;;  %v552_v55 = vpop.f32.mrb[9].mxu1 }
  0xf3   :  { %655 = vst [vmem:[#allocation2 + $0x40] sm:$0xff] %v424_v54  ;;  %687 = vst [vmem:[#allocation2 + $0x140] sm:$0xff] %v552_v55  ;;  %v846_v56 = vpop.f32.mrb[10].mxu0  ;;  %v878_v57 = vpop.f32.mrb[10].mxu1 }
  0xf4   :  { %658 = vst [vmem:[#allocation2 + $0x58] sm:$0xff] %v846_v56  ;;  %690 = vst [vmem:[#allocation2 + $0x158] sm:$0xff] %v878_v57  ;;  %v427_v58 = vpop.f32.mrb[11].mxu0  ;;  %v555_v59 = vpop.f32.mrb[11].mxu1 }
  0xf5   :  { %656 = vst [vmem:[#allocation2 + $0x48] sm:$0xff] %v427_v58  ;;  %688 = vst [vmem:[#allocation2 + $0x148] sm:$0xff] %v555_v59 }
  0xf9   :  { %v849_v60 = vpop.f32.mrb[12].mxu0  ;;  %v881_v61 = vpop.f32.mrb[12].mxu1 }
  0xfa   :  { %661 = vst [vmem:[#allocation2 + $0x70] sm:$0xff] %v849_v60  ;;  %693 = vst [vmem:[#allocation2 + $0x170] sm:$0xff] %v881_v61  ;;  %v440_v62 = vpop.f32.mrb[13].mxu0  ;;  %v568_v63 = vpop.f32.mrb[13].mxu1 }
  0xfb   :  { %659 = vst [vmem:[#allocation2 + $0x60] sm:$0xff] %v440_v62  ;;  %691 = vst [vmem:[#allocation2 + $0x160] sm:$0xff] %v568_v63  ;;  %v850_v0 = vpop.f32.mrb[14].mxu0  ;;  %v882_v1 = vpop.f32.mrb[14].mxu1 }
  0xfc   :  { %662 = vst [vmem:[#allocation2 + $0x78] sm:$0xff] %v850_v0  ;;  %694 = vst [vmem:[#allocation2 + $0x178] sm:$0xff] %v882_v1  ;;  %v443_v2 = vpop.f32.mrb[15].mxu0  ;;  %v571_v3 = vpop.f32.mrb[15].mxu1 }
  0xfd   :  { %660 = vst [vmem:[#allocation2 + $0x68] sm:$0xff] %v443_v2  ;;  %692 = vst [vmem:[#allocation2 + $0x168] sm:$0xff] %v571_v3 }
 0x101   :  { %v853_v4 = vpop.f32.mrb[16].mxu0  ;;  %v885_v5 = vpop.f32.mrb[16].mxu1 }
 0x102   :  { %665 = vst [vmem:[#allocation2 + $0x90] sm:$0xff] %v853_v4  ;;  %697 = vst [vmem:[#allocation2 + $0x190] sm:$0xff] %v885_v5  ;;  %v456_v6 = vpop.f32.mrb[17].mxu0  ;;  %v584_v7 = vpop.f32.mrb[17].mxu1 }
 0x103   :  { %663 = vst [vmem:[#allocation2 + $0x80] sm:$0xff] %v456_v6  ;;  %695 = vst [vmem:[#allocation2 + $0x180] sm:$0xff] %v584_v7  ;;  %v854_v8 = vpop.f32.mrb[18].mxu0  ;;  %v886_v9 = vpop.f32.mrb[18].mxu1 }
 0x104   :  { %666 = vst [vmem:[#allocation2 + $0x98] sm:$0xff] %v854_v8  ;;  %698 = vst [vmem:[#allocation2 + $0x198] sm:$0xff] %v886_v9  ;;  %v459_v10 = vpop.f32.mrb[19].mxu0  ;;  %v587_v11 = vpop.f32.mrb[19].mxu1 }
 0x105   :  { %664 = vst [vmem:[#allocation2 + $0x88] sm:$0xff] %v459_v10  ;;  %696 = vst [vmem:[#allocation2 + $0x188] sm:$0xff] %v587_v11 }
 0x109   :  { %v857_v12 = vpop.f32.mrb[20].mxu0  ;;  %v889_v13 = vpop.f32.mrb[20].mxu1 }
 0x10a   :  { %669 = vst [vmem:[#allocation2 + $0xb0] sm:$0xff] %v857_v12  ;;  %701 = vst [vmem:[#allocation2 + $0x1b0] sm:$0xff] %v889_v13  ;;  %v472_v14 = vpop.f32.mrb[21].mxu0  ;;  %v600_v15 = vpop.f32.mrb[21].mxu1 }
 0x10b   :  { %667 = vst [vmem:[#allocation2 + $0xa0] sm:$0xff] %v472_v14  ;;  %699 = vst [vmem:[#allocation2 + $0x1a0] sm:$0xff] %v600_v15  ;;  %v858_v16 = vpop.f32.mrb[22].mxu0  ;;  %v890_v17 = vpop.f32.mrb[22].mxu1 }
 0x10c   :  { %670 = vst [vmem:[#allocation2 + $0xb8] sm:$0xff] %v858_v16  ;;  %702 = vst [vmem:[#allocation2 + $0x1b8] sm:$0xff] %v890_v17  ;;  %v475_v18 = vpop.f32.mrb[23].mxu0  ;;  %v603_v19 = vpop.f32.mrb[23].mxu1 }
 0x10d   :  { %668 = vst [vmem:[#allocation2 + $0xa8] sm:$0xff] %v475_v18  ;;  %700 = vst [vmem:[#allocation2 + $0x1a8] sm:$0xff] %v603_v19 }
 0x111   :  { %v861_v20 = vpop.f32.mrb[24].mxu0  ;;  %v893_v21 = vpop.f32.mrb[24].mxu1 }
 0x112   :  { %673 = vst [vmem:[#allocation2 + $0xd0] sm:$0xff] %v861_v20  ;;  %705 = vst [vmem:[#allocation2 + $0x1d0] sm:$0xff] %v893_v21  ;;  %v488_v22 = vpop.f32.mrb[25].mxu0  ;;  %v616_v23 = vpop.f32.mrb[25].mxu1 }
 0x113   :  { %671 = vst [vmem:[#allocation2 + $0xc0] sm:$0xff] %v488_v22  ;;  %703 = vst [vmem:[#allocation2 + $0x1c0] sm:$0xff] %v616_v23  ;;  %v862_v24 = vpop.f32.mrb[26].mxu0  ;;  %v894_v25 = vpop.f32.mrb[26].mxu1 }
 0x114   :  { %674 = vst [vmem:[#allocation2 + $0xd8] sm:$0xff] %v862_v24  ;;  %706 = vst [vmem:[#allocation2 + $0x1d8] sm:$0xff] %v894_v25  ;;  %v491_v26 = vpop.f32.mrb[27].mxu0  ;;  %v619_v27 = vpop.f32.mrb[27].mxu1 }
 0x115   :  { %672 = vst [vmem:[#allocation2 + $0xc8] sm:$0xff] %v491_v26  ;;  %704 = vst [vmem:[#allocation2 + $0x1c8] sm:$0xff] %v619_v27 }
 0x119   :  { %v865_v28 = vpop.f32.mrb[28].mxu0  ;;  %v897_v29 = vpop.f32.mrb[28].mxu1 }
 0x11a   :  { %677 = vst [vmem:[#allocation2 + $0xf0] sm:$0xff] %v865_v28  ;;  %709 = vst [vmem:[#allocation2 + $0x1f0] sm:$0xff] %v897_v29  ;;  %v504_v30 = vpop.f32.mrb[29].mxu0  ;;  %v632_v31 = vpop.f32.mrb[29].mxu1 }
 0x11b   :  { %675 = vst [vmem:[#allocation2 + $0xe0] sm:$0xff] %v504_v30  ;;  %707 = vst [vmem:[#allocation2 + $0x1e0] sm:$0xff] %v632_v31  ;;  %v866_v32 = vpop.f32.mrb[30].mxu0  ;;  %v898_v33 = vpop.f32.mrb[30].mxu1 }
 0x11c   :  { %678 = vst [vmem:[#allocation2 + $0xf8] sm:$0xff] %v866_v32  ;;  %710 = vst [vmem:[#allocation2 + $0x1f8] sm:$0xff] %v898_v33  ;;  %v507_v34 = vpop.f32.mrb[31].mxu0  ;;  %v635_v35 = vpop.f32.mrb[31].mxu1 }
 0x11d   :  { %676 = vst [vmem:[#allocation2 + $0xe8] sm:$0xff] %v507_v34  ;;  %708 = vst [vmem:[#allocation2 + $0x1e8] sm:$0xff] %v635_v35 }
 0x11e   :  { %956 = shalt.err (!%p953_p4)
}
 0x11f   :  { %s957_s24 = scalar_lea.hbm %s1138_s2, 8192 }
 0x120   :  { %p958_p5 = scmp.ne.s32.totalorder %s1138_s2, %s957_s24  ;;  %p961_p6 = scmp.lt.u32.totalorder %s957_s24, %s1138_s2 }
 0x122   :  { %p963_p7 = pnand %p961_p6, %p958_p5 }
 0x124   :  { %966 = shalt.err (!%p963_p7)
}
 0x125   :  { %s970_s29 = smov 128   ;;  %s971_s30 = smov 8  }
 0x126   :  { %722 = dma.vmem_to_hbm [thread:$0]  %s717_s20, 8192, %s1138_s2, [#allocation3], %s970_s29, %s970_s29, %s971_s30  }
 0x127   :  { %967 = dma.done.wait [#allocation3], 8192  }
 0x128   :  { %968 = vsyncadd [#allocation3], 4294959104 }
 0x129   :  { %726 = vsyncpa [#allocation3], 1 }

</bundles_post_ra>
